<compile_context>
chip_gen: v7x
topology: tpu7x:2x2x1
jax: 0.10.0
libtpu: 0.0.40
codegen_flags: <defaults>
</compile_context>

<pallas_src>
import jax
import jax.numpy as jnp
from jax import lax
from jax.experimental import pallas as pl
from jax.experimental.pallas import tpu as pltpu


def _relation_loss_kernel(s_ref, t_ref, acc_ref):
    """One grid step: a (CB, N) block of channels.

    acc_ref: (8, N) float32 output block used as a resident vreg-shaped
    partial-sum accumulator across the sequential channel-block axis.
    """
    @pl.when(pl.program_id(0) == 0)
    def _init():
        acc_ref[...] = jnp.zeros_like(acc_ref)

    # Cast after the DMA so HBM traffic stays in the input dtype.
    s = s_ref[...].astype(jnp.float32)   # (CB, N)
    t = t_ref[...].astype(jnp.float32)   # (CB, N)
    cb, n = s.shape

    # rel[c, i, j] = (f[c, j] - f[c, i])**2  -> squared relation difference
    ds = s[:, None, :] - s[:, :, None]   # (CB, N, N)
    dt = t[:, None, :] - t[:, :, None]
    d = ds * ds - dt * dt
    d2 = d * d

    if n % 8 == 0:
        # Sum only over the sublane-stacked axis: pure VALU vreg adds,
        # no per-step cross-lane (XLU) reduction, no serializing scalar store.
        partial = jnp.sum(d2.reshape(cb * n // 8, 8, n), axis=0)        # (8, N)
    else:
        # Rare fallback (N not a multiple of 8): place the (N,) row sum in
        # sublane 0 of the accumulator.
        row = jnp.sum(d2, axis=(0, 1))[None, :]                          # (1, N)
        sub = lax.broadcasted_iota(jnp.int32, (8, n), 0)
        partial = jnp.where(sub == 0, jnp.broadcast_to(row, (8, n)), 0.0)

    acc_ref[...] = acc_ref[...] + partial


def _pick_channel_block(C, N):
    """Channels per grid step: big enough to amortize ~600-cycle step overhead,
    small enough that the ~4 * CB * N * N * 4 B of f32 temporaries stay well
    inside VMEM on all generations (incl. v7x's 64 MiB)."""
    budget = max(1, (8 << 20) // (16 * N * N))   # CB s.t. temporaries <= ~8 MiB
    if C <= budget:
        return C                                  # single grid step
    best = None
    m = 8                                         # (8,128) rule: CB % 8 == 0
    while m <= min(C, budget):
        if C % m == 0:
            best = m
        m += 8
    if best is not None:
        return best
    # TODO(synk): for very large C*N with no clean CB divisor (or huge N),
    # additionally tile the N x N relation matrix; not needed at these sizes.
    return C


@jax.jit
def relation_loss_pallas(feature_s, feature_t):
    """Scalar mean((rel_s - rel_t)**2) over (C, N, N), computed in Pallas."""
    assert feature_s.shape == feature_t.shape
    assert feature_s.ndim == 2
    C, N = feature_s.shape
    CB = _pick_channel_block(C, N)
    grid = (C // CB,)

    partials = pl.pallas_call(
        _relation_loss_kernel,
        out_shape=jax.ShapeDtypeStruct((8, N), jnp.float32),
        grid_spec=pltpu.PrefetchScalarGridSpec(
            num_scalar_prefetch=0,
            grid=grid,
            in_specs=[
                pl.BlockSpec((CB, N), lambda c: (c, 0)),   # streamed channel blocks
                pl.BlockSpec((CB, N), lambda c: (c, 0)),
            ],
            # Constant index_map -> resident accumulator across the grid.
            out_specs=pl.BlockSpec((8, N), lambda c: (0, 0)),
        ),
        compiler_params=pltpu.CompilerParams(
            dimension_semantics=("arbitrary",)),   # sequential channel reduction
    )(feature_s, feature_t)

    # Single tiny cross-lane reduce + F.mse_loss('mean') denominator.
    inv_denom = 1.0 / (float(C) * float(N) * float(N))
    return jnp.sum(partials) * inv_denom


class RelationLoss:
    """JAX/Pallas port of mmrotate RelationLoss (no learnable parameters)."""

    def __init__(self, reduction="mean", loss_weight=1.0):
        self.reduction = reduction
        self.loss_weight = loss_weight

    def __call__(self, x, soft_target, weight=None, avg_factor=None,
                 reduction_override=None):
        assert reduction_override in (None, "none", "mean", "sum")
        # The inner F.mse_loss already yields a scalar, so the outer
        # weighted_loss reduction does not change the value.
        # TODO(synk): per-element `weight`/`avg_factor` handling of the
        # weighted_loss decorator is a no-op for scalar losses and is skipped.
        loss = relation_loss_pallas(x, soft_target)
        return self.loss_weight * loss


def _relation_loss_ref(s, t):
    """Pure-JAX reference mirroring the PyTorch code."""
    rel_s = (s[:, None, :] - s[:, :, None]) ** 2
    rel_t = (t[:, None, :] - t[:, :, None]) ** 2
    return jnp.mean((rel_s - rel_t) ** 2)


if __name__ == "__main__":
    key = jax.random.PRNGKey(0)
    loss_mod = RelationLoss(reduction="mean", loss_weight=1.0)

    # Small deterministic inputs: C=4 channels, N=128 flattened positions
    # (single grid step, CB=C).
    k1, k2, k3, k4 = jax.random.split(key, 4)
    C, N = 4, 128
    feature_s = jax.random.normal(k1, (C, N), dtype=jnp.float32)
    feature_t = jax.random.normal(k2, (C, N), dtype=jnp.float32)
    loss = jax.block_until_ready(loss_mod(feature_s, feature_t))
    ref = jax.block_until_ready(_relation_loss_ref(feature_s, feature_t))
    assert jnp.allclose(loss, ref, rtol=1e-5, atol=1e-5), (loss, ref)

    # Slightly larger case exercising the streamed channel-block path
    # (C=32, N=256 -> CB=8, grid=(4,)).
    C2, N2 = 32, 256
    fs2 = jax.random.normal(k3, (C2, N2), dtype=jnp.float32)
    ft2 = jax.random.normal(k4, (C2, N2), dtype=jnp.float32)
    loss2 = jax.block_until_ready(loss_mod(fs2, ft2))
    ref2 = jax.block_until_ready(_relation_loss_ref(fs2, ft2))
    assert jnp.allclose(loss2, ref2, rtol=1e-4, atol=1e-5), (loss2, ref2)

    print("KERNEL_OK")
</pallas_src>

<mosaic_0001>
module attributes {stable_mosaic.version = 11 : i64} {
  func.func @_relation_loss_kernel(%arg0: i32, %arg1: memref<4x128xf32, #tpu.memory_space<vmem>>, %arg2: memref<4x128xf32, #tpu.memory_space<vmem>>, %arg3: memref<8x128xf32, #tpu.memory_space<vmem>>) attributes {dimension_semantics = [#tpu.dimension_semantics<arbitrary>], iteration_bounds = array<i64: 1>, scalar_prefetch = 0 : i64, scratch_operands = 0 : i64, tpu.core_type = #tpu.core_type<tc>, window_params = [{transform_indices = @transform_0, window_bounds = array<i64: 4, 128>}, {transform_indices = @transform_1, window_bounds = array<i64: 4, 128>}, {pipeline_mode = #tpu.pipeline_mode<synchronous>, transform_indices = @transform_2, window_bounds = array<i64: 8, 128>}]} {
    %c0_i32 = arith.constant 0 : i32
    %0 = arith.cmpi eq, %arg0, %c0_i32 : i32
    %1 = arith.extui %0 : i1 to i32
    %c0_i32_0 = arith.constant 0 : i32
    %2 = arith.cmpi ne, %1, %c0_i32_0 : i32
    scf.if %2 {
      %cst_8 = arith.constant 0.000000e+00 : f32
      %24 = vector.broadcast %cst_8 : f32 to vector<8x128xf32>
      %c0_9 = arith.constant 0 : index
      %c0_10 = arith.constant 0 : index
      %25 = vector.load %arg3[%c0_9, %c0_10] : memref<8x128xf32, #tpu.memory_space<vmem>>, vector<8x128xf32>
      tpu.vector_store %arg3[%c0_9, %c0_10], %24 {strides = array<i32>} : memref<8x128xf32, #tpu.memory_space<vmem>>, vector<8x128xf32>,
    } else {
    }
    %c0 = arith.constant 0 : index
    %c0_1 = arith.constant 0 : index
    %3 = vector.load %arg1[%c0, %c0_1] : memref<4x128xf32, #tpu.memory_space<vmem>>, vector<4x128xf32>
    %c0_2 = arith.constant 0 : index
    %c0_3 = arith.constant 0 : index
    %4 = vector.load %arg2[%c0_2, %c0_3] : memref<4x128xf32, #tpu.memory_space<vmem>>, vector<4x128xf32>
    %5 = vector.shape_cast %3 : vector<4x128xf32> to vector<4x1x128xf32>
    %6 = vector.shape_cast %3 : vector<4x128xf32> to vector<4x128x1xf32>
    %7 = vector.broadcast %5 : vector<4x1x128xf32> to vector<4x128x128xf32>
    %8 = vector.broadcast %6 : vector<4x128x1xf32> to vector<4x128x128xf32>
    %9 = arith.subf %7, %8 : vector<4x128x128xf32>
    %10 = vector.shape_cast %4 : vector<4x128xf32> to vector<4x1x128xf32>
    %11 = vector.shape_cast %4 : vector<4x128xf32> to vector<4x128x1xf32>
    %12 = vector.broadcast %10 : vector<4x1x128xf32> to vector<4x128x128xf32>
    %13 = vector.broadcast %11 : vector<4x128x1xf32> to vector<4x128x128xf32>
    %14 = arith.subf %12, %13 : vector<4x128x128xf32>
    %15 = arith.mulf %9, %9 : vector<4x128x128xf32>
    %16 = arith.mulf %14, %14 : vector<4x128x128xf32>
    %17 = arith.subf %15, %16 : vector<4x128x128xf32>
    %18 = arith.mulf %17, %17 : vector<4x128x128xf32>
    %19 = vector.shape_cast %18 : vector<4x128x128xf32> to vector<64x8x128xf32>
    %cst = arith.constant dense<0.000000e+00> : vector<8x128xf32>
    %20 = vector.multi_reduction <add>, %19, %cst [0] : vector<64x8x128xf32> to vector<8x128xf32>
    %c0_4 = arith.constant 0 : index
    %c0_5 = arith.constant 0 : index
    %21 = vector.load %arg3[%c0_4, %c0_5] : memref<8x128xf32, #tpu.memory_space<vmem>>, vector<8x128xf32>
    %22 = arith.addf %21, %20 : vector<8x128xf32>
    %c0_6 = arith.constant 0 : index
    %c0_7 = arith.constant 0 : index
    %23 = vector.load %arg3[%c0_6, %c0_7] : memref<8x128xf32, #tpu.memory_space<vmem>>, vector<8x128xf32>
    tpu.vector_store %arg3[%c0_6, %c0_7], %22 {strides = array<i32>} : memref<8x128xf32, #tpu.memory_space<vmem>>, vector<8x128xf32>,
    return
  }
  func.func @transform_0(%arg0: i32) -> (i32, i32) {
    %c0_i32 = arith.constant 0 : i32
    %c0_i32_0 = arith.constant 0 : i32
    return %arg0, %c0_i32 : i32, i32
  }
  func.func @transform_1(%arg0: i32) -> (i32, i32) {
    %c0_i32 = arith.constant 0 : i32
    %c0_i32_0 = arith.constant 0 : i32
    return %arg0, %c0_i32 : i32, i32
  }
  func.func @transform_2(%arg0: i32) -> (i32, i32) {
    %c0_i32 = arith.constant 0 : i32
    %c0_i32_0 = arith.constant 0 : i32
    %c0_i32_1 = arith.constant 0 : i32
    return %c0_i32, %c0_i32_0 : i32, i32
  }
}

</mosaic_0001>

<bundles_post_ra>
// kernel: relation_loss_pallas.1
= control target key start
LH: loop header
LB: loop body
LE: loop exit
PB: predicated region body
PF: predicated region fallthrough
CT: control target
= control target key end

     0   :  { %7 = vsyncpa [#allocation3], 0  ;;  %s1542_s0 = inlined_call_operand.hbm [shape: f32[4,128], index: 0, kind: input, shape index: {}]   ;;  %s1543_s1 = inlined_call_operand.hbm [shape: f32[4,128], index: 1, kind: input, shape index: {}]   ;;  %s1544_s2 = inlined_call_operand.vmem [shape: f32[8,128], index: 2, kind: output, shape index: {}]  }
   0x1   :  { %8 = vsyncpa [#allocation5], 0  ;;  %s1176_s9 = smov [#allocation2]   ;;  %s1177_s11 = smov [#allocation4]  }
   0x2   :  { %s15_s10 = sshll.u32 %s1176_s9, 4  ;;  %s25_s12 = sshll.u32 %s1177_s11, 4  ;;  %s16_s10 = int_to_ptr.vmem [resolvable:$true] %s15_s10  ;;  %s26_s12 = int_to_ptr.vmem [resolvable:$true] %s25_s12 }
   0x3   :  { %s1128_s15 = scalar_lea.hbm %s1542_s0, 64 }
   0x4   :  { %p1129_p0 = scmp.ne.s32.totalorder %s1542_s0, %s1128_s15  ;;  %p1132_p1 = scmp.lt.u32.totalorder %s1128_s15, %s1542_s0 }
   0x6   :  { %p1134_p2 = pnand %p1132_p1, %p1129_p0 }
   0x8   :  { %1137 = shalt.err (!%p1134_p2)
}
   0x9   :  { %s1138_s20 = scalar_lea.vmem %s16_s10, 64  ;;  %p1143_p4 = scmp.lt.s32.totalorder %s16_s10, %s16_s10 }
   0xa   :  { %p1139_p3 = scmp.ne.s32.totalorder %s16_s10, %s1138_s20  ;;  %p1144_p5 = scmp.lt.s32.totalorder %s1138_s20, %s1138_s20 }
   0xc   :  { %p1145_p6 = por %p1144_p5, %p1143_p4 }
   0xe   :  { %p1146_p7 = pnand %p1145_p6, %p1139_p3 }
  0x10   :  { %1149 = shalt.err (!%p1146_p7)
}
  0x11   :  { %18 = dma.hbm_to_vmem [thread:$0]  %s1542_s0, 64, %s16_s10, [#allocation3]  }
  0x12   :  { %s1150_s25 = scalar_lea.hbm %s1543_s1, 64 }
  0x13   :  { %p1151_p8 = scmp.ne.s32.totalorder %s1543_s1, %s1150_s25  ;;  %p1154_p9 = scmp.lt.u32.totalorder %s1150_s25, %s1543_s1 }
  0x15   :  { %p1156_p10 = pnand %p1154_p9, %p1151_p8 }
  0x17   :  { %1159 = shalt.err (!%p1156_p10)
}
  0x18   :  { %s1160_s30 = scalar_lea.vmem %s26_s12, 64  ;;  %p1165_p12 = scmp.lt.s32.totalorder %s26_s12, %s26_s12 }
  0x19   :  { %p1161_p11 = scmp.ne.s32.totalorder %s26_s12, %s1160_s30  ;;  %p1166_p13 = scmp.lt.s32.totalorder %s1160_s30, %s1160_s30 }
  0x1b   :  { %p1167_p0 = por %p1166_p13, %p1165_p12 }
  0x1d   :  { %p1168_p1 = pnand %p1167_p0, %p1161_p11 }
  0x1f   :  { %1171 = shalt.err (!%p1168_p1)
}
  0x20   :  { %28 = dma.hbm_to_vmem [thread:$0]  %s1543_s1, 64, %s26_s12, [#allocation5]  }
  0x21   :  { %1172 = dma.done.wait [#allocation3], 64  }
  0x22   :  { %1173 = vsyncadd [#allocation3], 4294967232 }
  0x23   :  { %1174 = dma.done.wait [#allocation5], 64  }
  0x24   :  { %1175 = vsyncadd [#allocation5], 4294967232  ;;  %v46_v0 = vlaneseq  ;;  %v1178_v1 = vmov 1966171168   ;;  %v40_v9 = vld [vmem:[#allocation2] sm:$0xf] }
  0x25   :  { %v44_v2 = vunpack.c.l.s4 %v1178_v1  ;;  %v1224_v10 = vld [vmem:[#allocation4] sm:$0xf] }
  0x26   :  { %v1218_v3 = vshrl.u32 %v46_v0, 7 }
  0x27   :  { %v45_v4 = vunpack.c.0.s8 %v44_v2 }
  0x28   :  { %v69_v5 = vsub.s32 0, %v1218_v3  ;;  %v203_v6 = vsub.s32 2, %v1218_v3  ;;  %v270_v8 = vsub.s32 3, %v1218_v3  ;;  %v136_v36 = vsub.s32 1, %v1218_v3 }
  0x29   :  { %v48_v7 = vsub.s32 %v45_v4, %v1218_v3 }
  0x2a   :  { %v70_v12 = vrot.slane %v40_v9, %v69_v5  ;;  %v1226_v13 = vrot.slane %v40_v9, %v203_v6  ;;  %v1228_v14 = vrot.slane %v40_v9, %v270_v8  ;;  %v1232_v18 = vrot.slane %v1224_v10, %v203_v6 }
  0x2b   :  { %v49_v11 = vrot.slane %v40_v9, %v48_v7  ;;  %v426_v15 = vrot.slane %v1224_v10, %v48_v7  ;;  %v1235_v19 = vrot.slane %v1224_v10, %v270_v8  ;;  %v137_v37 = vrot.slane %v40_v9, %v136_v36 }
  0x2c   :  { %80 = vbcast.lane.b32.xlu1 %v70_v12, 272  ;;  %72 = vbcast.lane.b32.xlu0 %v70_v12, 256  ;;  %v447_v38 = vrot.slane %v1224_v10, %v69_v5  ;;  %v514_v39 = vrot.slane %v1224_v10, %v136_v36 }
  0x2d   :  { %v50_v16 = vcombine.high %v49_v11, %v49_v11  ;;  %v57_v17 = vrot.slane %v49_v11, %v48_v7  ;;  %v427_v20 = vcombine.high %v426_v15, %v426_v15  ;;  %v434_v21 = vrot.slane %v426_v15, %v48_v7 }
  0x2f   :  { %v64_v22 = vrot.slane %v50_v16, %v48_v7  ;;  %v65_v23 = vcombine.high %v57_v17, %v57_v17  ;;  %v1237_v24 = vrot.slane %v57_v17, %v69_v5  ;;  %v441_v25 = vrot.slane %v427_v20, %v48_v7 }
  0x30   :  { %v442_v26 = vcombine.high %v434_v21, %v434_v21  ;;  %v1239_v27 = vrot.slane %v434_v21, %v69_v5  ;;  %84 = vbcast.lane.b32.xlu1 %v70_v12, 280  ;;  %76 = vbcast.lane.b32.xlu0 %v70_v12, 264 }
  0x31   :  { %v66_v28 = vcombine.high %v64_v22, %v64_v22  ;;  %v1241_v29 = vrot.slane %v64_v22, %v69_v5  ;;  %v1243_v30 = vrot.slane %v65_v23, %v69_v5  ;;  %v443_v31 = vcombine.high %v441_v25, %v441_v25 }
  0x32   :  { %v1245_v32 = vrot.slane %v441_v25, %v69_v5  ;;  %v1247_v33 = vrot.slane %v442_v26, %v69_v5 }
  0x33   :  { %v1249_v34 = vrot.slane %v66_v28, %v69_v5  ;;  %v1251_v35 = vrot.slane %v443_v31, %v69_v5 }
  0x34   :  { %92 = vbcast.lane.b32.xlu1 %v70_v12, 296  ;;  %88 = vbcast.lane.b32.xlu0 %v70_v12, 288 }
  0x38   :  { %100 = vbcast.lane.b32.xlu1 %v70_v12, 312  ;;  %96 = vbcast.lane.b32.xlu0 %v70_v12, 304 }
  0x3c   :  { %108 = vbcast.lane.b32.xlu1 %v70_v12, 328  ;;  %104 = vbcast.lane.b32.xlu0 %v70_v12, 320 }
  0x40   :  { %116 = vbcast.lane.b32.xlu1 %v70_v12, 344  ;;  %112 = vbcast.lane.b32.xlu0 %v70_v12, 336 }
  0x44   :  { %124 = vbcast.lane.b32.xlu1 %v70_v12, 360  ;;  %120 = vbcast.lane.b32.xlu0 %v70_v12, 352 }
  0x48   :  { %132 = vbcast.lane.b32.xlu1 %v70_v12, 376  ;;  %128 = vbcast.lane.b32.xlu0 %v70_v12, 368 }
  0x4c   :  { %143 = vbcast.lane.b32.xlu1 %v137_v37, 264  ;;  %139 = vbcast.lane.b32.xlu0 %v137_v37, 256 }
  0x50   :  { %151 = vbcast.lane.b32.xlu1 %v137_v37, 280  ;;  %147 = vbcast.lane.b32.xlu0 %v137_v37, 272 }
  0x54   :  { %159 = vbcast.lane.b32.xlu1 %v137_v37, 296  ;;  %155 = vbcast.lane.b32.xlu0 %v137_v37, 288 }
  0x58   :  { %167 = vbcast.lane.b32.xlu1 %v137_v37, 312  ;;  %163 = vbcast.lane.b32.xlu0 %v137_v37, 304 }
  0x5c   :  { %175 = vbcast.lane.b32.xlu1 %v137_v37, 328  ;;  %171 = vbcast.lane.b32.xlu0 %v137_v37, 320 }
  0x60   :  { %183 = vbcast.lane.b32.xlu1 %v137_v37, 344  ;;  %179 = vbcast.lane.b32.xlu0 %v137_v37, 336 }
  0x64   :  { %191 = vbcast.lane.b32.xlu1 %v137_v37, 360  ;;  %187 = vbcast.lane.b32.xlu0 %v137_v37, 352 }
  0x68   :  { %449 = vbcast.lane.b32.xlu1 %v447_v38, 256  ;;  %195 = vbcast.lane.b32.xlu0 %v137_v37, 368 }
  0x6c   :  { %457 = vbcast.lane.b32.xlu1 %v447_v38, 272  ;;  %453 = vbcast.lane.b32.xlu0 %v447_v38, 264 }
  0x70   :  { %465 = vbcast.lane.b32.xlu1 %v447_v38, 288  ;;  %461 = vbcast.lane.b32.xlu0 %v447_v38, 280 }
  0x74   :  { %473 = vbcast.lane.b32.xlu1 %v447_v38, 304  ;;  %469 = vbcast.lane.b32.xlu0 %v447_v38, 296 }
  0x78   :  { %481 = vbcast.lane.b32.xlu1 %v447_v38, 320  ;;  %477 = vbcast.lane.b32.xlu0 %v447_v38, 312 }
  0x7c   :  { %489 = vbcast.lane.b32.xlu1 %v447_v38, 336  ;;  %485 = vbcast.lane.b32.xlu0 %v447_v38, 328 }
  0x80   :  { %497 = vbcast.lane.b32.xlu1 %v447_v38, 352  ;;  %493 = vbcast.lane.b32.xlu0 %v447_v38, 344 }
  0x84   :  { %505 = vbcast.lane.b32.xlu1 %v447_v38, 368  ;;  %501 = vbcast.lane.b32.xlu0 %v447_v38, 360 }
  0x88   :  { %516 = vbcast.lane.b32.xlu1 %v514_v39, 256  ;;  %509 = vbcast.lane.b32.xlu0 %v447_v38, 376 }
  0x8c   :  { %524 = vbcast.lane.b32.xlu1 %v514_v39, 272  ;;  %520 = vbcast.lane.b32.xlu0 %v514_v39, 264 }
  0x90   :  { %532 = vbcast.lane.b32.xlu1 %v514_v39, 288  ;;  %528 = vbcast.lane.b32.xlu0 %v514_v39, 280 }
  0x94   :  { %540 = vbcast.lane.b32.xlu1 %v514_v39, 304  ;;  %536 = vbcast.lane.b32.xlu0 %v514_v39, 296 }
  0x98   :  { %548 = vbcast.lane.b32.xlu1 %v514_v39, 320  ;;  %544 = vbcast.lane.b32.xlu0 %v514_v39, 312 }
  0x9c   :  { %556 = vbcast.lane.b32.xlu1 %v514_v39, 336  ;;  %552 = vbcast.lane.b32.xlu0 %v514_v39, 328 }
  0x9e   :  { %v1256_v40 = vpop.permute.xlu1 %80  ;;  %v73_v41 = vpop.permute.xlu0 %72 }
  0x9f   :  { %v355_v6 = vsub.f32 %v1237_v24, %v73_v41  ;;  %v357_v11 = vsub.f32 %v1237_v24, %v1256_v40 }
  0xa0   :  { %564 = vbcast.lane.b32.xlu1 %v514_v39, 352  ;;  %560 = vbcast.lane.b32.xlu0 %v514_v39, 344 }
  0xa1   :  { %v796_v12 = vmul.f32 %v355_v6, %v355_v6  ;;  %v798_v25 = vmul.f32 %v357_v11, %v357_v11 }
  0xa2   :  { %v1258_v42 = vpop.permute.xlu1 %84  ;;  %v1260_v43 = vpop.permute.xlu0 %76 }
  0xa3   :  { %v356_v16 = vsub.f32 %v1237_v24, %v1260_v43  ;;  %v358_v26 = vsub.f32 %v1237_v24, %v1258_v42 }
  0xa4   :  { %572 = vbcast.lane.b32.xlu1 %v514_v39, 368  ;;  %568 = vbcast.lane.b32.xlu0 %v514_v39, 360 }
  0xa5   :  { %v797_v36 = vmul.f32 %v356_v16, %v356_v16 }
  0xa6   :  { %v1262_v44 = vpop.permute.xlu1 %92  ;;  %v1264_v45 = vpop.permute.xlu0 %88 }
  0xa7   :  { %v359_v28 = vsub.f32 %v1237_v24, %v1264_v45 }
  0xa8   :  { %576 = vbcast.lane.b32.xlu1 %v514_v39, 376  ;;  %199 = vbcast.lane.b32.xlu0 %v137_v37, 376 }
  0xa9   :  { %v800_v42 = vmul.f32 %v359_v28, %v359_v28 }
  0xaa   :  { %v1266_v46 = vpop.permute.xlu1 %100  ;;  %v1268_v47 = vpop.permute.xlu0 %96 }
  0xab   :  { %v361_v45 = vsub.f32 %v1237_v24, %v1268_v47  ;;  %v362_v47 = vsub.f32 %v1237_v24, %v1266_v46 }
  0xac   :  { %583 = vbcast.lane.b32.xlu1 %v1232_v18, 256  ;;  %206 = vbcast.lane.b32.xlu0 %v1226_v13, 256 }
  0xae   :  { %v1272_v48 = vpop.permute.xlu1 %108  ;;  %v1274_v49 = vpop.permute.xlu0 %104 }
  0xb0   :  { %587 = vbcast.lane.b32.xlu1 %v1232_v18, 264  ;;  %210 = vbcast.lane.b32.xlu0 %v1226_v13, 264 }
  0xb2   :  { %v1278_v50 = vpop.permute.xlu1 %116  ;;  %v1280_v51 = vpop.permute.xlu0 %112 }
  0xb4   :  { %591 = vbcast.lane.b32.xlu1 %v1232_v18, 272  ;;  %214 = vbcast.lane.b32.xlu0 %v1226_v13, 272 }
  0xb6   :  { %v1284_v52 = vpop.permute.xlu1 %124  ;;  %v1286_v53 = vpop.permute.xlu0 %120 }
  0xb8   :  { %595 = vbcast.lane.b32.xlu1 %v1232_v18, 280  ;;  %218 = vbcast.lane.b32.xlu0 %v1226_v13, 280 }
  0xba   :  { %v1290_v54 = vpop.permute.xlu1 %132  ;;  %v1292_v55 = vpop.permute.xlu0 %128 }
  0xbc   :  { %599 = vbcast.lane.b32.xlu1 %v1232_v18, 288  ;;  %222 = vbcast.lane.b32.xlu0 %v1226_v13, 288 }
  0xbe   :  { %v1296_v56 = vpop.permute.xlu1 %143  ;;  %v1298_v57 = vpop.permute.xlu0 %139 }
  0xc0   :  { %603 = vbcast.lane.b32.xlu1 %v1232_v18, 296  ;;  %226 = vbcast.lane.b32.xlu0 %v1226_v13, 296 }
  0xc2   :  { %v1302_v58 = vpop.permute.xlu1 %151  ;;  %v1304_v59 = vpop.permute.xlu0 %147 }
  0xc4   :  { %607 = vbcast.lane.b32.xlu1 %v1232_v18, 304  ;;  %230 = vbcast.lane.b32.xlu0 %v1226_v13, 304 }
  0xc6   :  { %v1308_v60 = vpop.permute.xlu1 %159  ;;  %v1310_v61 = vpop.permute.xlu0 %155 }
  0xc8   :  { %611 = vbcast.lane.b32.xlu1 %v1232_v18, 312  ;;  %234 = vbcast.lane.b32.xlu0 %v1226_v13, 312 }
  0xca   :  { %v1314_v62 = vpop.permute.xlu1 %167  ;;  %v1316_v63 = vpop.permute.xlu0 %163 }
  0xcc   :  { %615 = vbcast.lane.b32.xlu1 %v1232_v18, 320  ;;  %238 = vbcast.lane.b32.xlu0 %v1226_v13, 320 }
  0xce   :  { %v1320_v0 = vpop.permute.xlu1 %175  ;;  %v1322_v1 = vpop.permute.xlu0 %171 }
  0xd0   :  { %619 = vbcast.lane.b32.xlu1 %v1232_v18, 328  ;;  %242 = vbcast.lane.b32.xlu0 %v1226_v13, 328 }
  0xd2   :  { %v1326_v2 = vpop.permute.xlu1 %183  ;;  %v1328_v3 = vpop.permute.xlu0 %179 }
  0xd4   :  { %623 = vbcast.lane.b32.xlu1 %v1232_v18, 336  ;;  %246 = vbcast.lane.b32.xlu0 %v1226_v13, 336 }
  0xd6   :  { %v1332_v4 = vpop.permute.xlu1 %191  ;;  %v1334_v5 = vpop.permute.xlu0 %187 }
  0xd8   :  { %627 = vbcast.lane.b32.xlu1 %v1232_v18, 344  ;;  %250 = vbcast.lane.b32.xlu0 %v1226_v13, 344 }
  0xda   :  { %v450_v7 = vpop.permute.xlu1 %449  ;;  %v196_v9 = vpop.permute.xlu0 %195 }
  0xdb   :  { %v732_v8 = vsub.f32 %v1239_v27, %v450_v7  ;;  %v1341_v10 = vsub.f32 %v1241_v29, %v196_v9  ;;  %v799_v7 = vmul.f32 %v358_v26, %v358_v26  ;;  %v360_v9 = vsub.f32 %v1237_v24, %v1262_v44 }
  0xdc   :  { %631 = vbcast.lane.b32.xlu1 %v1232_v18, 352  ;;  %254 = vbcast.lane.b32.xlu0 %v1226_v13, 352  ;;  %v363_v44 = vsub.f32 %v1237_v24, %v1274_v49  ;;  %v803_v49 = vmul.f32 %v362_v47, %v362_v47 }
  0xdd   :  { %v860_v15 = vmul.f32 %v732_v8, %v732_v8 }
  0xde   :  { %v458_v17 = vpop.permute.xlu1 %457  ;;  %v454_v22 = vpop.permute.xlu0 %453 }
  0xdf   :  { %v924_v20 = vsub.f32 %v796_v12, %v860_v15  ;;  %v734_v21 = vsub.f32 %v1239_v27, %v458_v17  ;;  %v733_v23 = vsub.f32 %v1239_v27, %v454_v22 }
  0xe0   :  { %635 = vbcast.lane.b32.xlu1 %v1232_v18, 360  ;;  %258 = vbcast.lane.b32.xlu0 %v1226_v13, 360 }
  0xe1   :  { %v862_v31 = vmul.f32 %v734_v21, %v734_v21  ;;  %v861_v37 = vmul.f32 %v733_v23, %v733_v23  ;;  %v988_v11 = vmul.f32 %v924_v20, %v924_v20 }
  0xe2   :  { %v466_v38 = vpop.permute.xlu1 %465  ;;  %v462_v41 = vpop.permute.xlu0 %461 }
  0xe3   :  { %v926_v39 = vsub.f32 %v798_v25, %v862_v31  ;;  %v736_v40 = vsub.f32 %v1239_v27, %v466_v38  ;;  %v925_v43 = vsub.f32 %v797_v36, %v861_v37  ;;  %v735_v6 = vsub.f32 %v1239_v27, %v462_v41 }
  0xe4   :  { %639 = vbcast.lane.b32.xlu1 %v1232_v18, 368  ;;  %262 = vbcast.lane.b32.xlu0 %v1226_v13, 368  ;;  %v802_v31 = vmul.f32 %v361_v45, %v361_v45  ;;  %v801_v36 = vmul.f32 %v360_v9, %v360_v9  ;;  %v804_v45 = vmul.f32 %v363_v44, %v363_v44 }
  0xe5   :  { %v864_v8 = vmul.f32 %v736_v40, %v736_v40  ;;  %v989_v12 = vmul.f32 %v925_v43, %v925_v43  ;;  %v863_v15 = vmul.f32 %v735_v6, %v735_v6  ;;  %v990_v23 = vmul.f32 %v926_v39, %v926_v39 }
  0xe6   :  { %v474_v16 = vpop.permute.xlu1 %473  ;;  %v470_v22 = vpop.permute.xlu0 %469  ;;  %v364_v9 = vsub.f32 %v1237_v24, %v1272_v48  ;;  %v367_v48 = vsub.f32 %v1237_v24, %v1286_v53 }
  0xe7   :  { %v928_v17 = vsub.f32 %v800_v42, %v864_v8  ;;  %v738_v21 = vsub.f32 %v1239_v27, %v474_v16  ;;  %v1052_v25 = vadd.f32 %v989_v12, %v988_v11  ;;  %v927_v26 = vsub.f32 %v799_v7, %v863_v15 }
  0xe8   :  { %v737_v28 = vsub.f32 %v1239_v27, %v470_v22  ;;  %643 = vbcast.lane.b32.xlu1 %v1232_v18, 376  ;;  %266 = vbcast.lane.b32.xlu0 %v1226_v13, 376  ;;  %v365_v13 = vsub.f32 %v1237_v24, %v1280_v51  ;;  %v366_v51 = vsub.f32 %v1237_v24, %v1278_v50 }
  0xe9   :  { %v866_v20 = vmul.f32 %v738_v21, %v738_v21  ;;  %v1053_v37 = vadd.f32 %v1052_v25, %v990_v23  ;;  %v991_v38 = vmul.f32 %v927_v26, %v927_v26  ;;  %v992_v18 = vmul.f32 %v928_v17, %v928_v17 }
  0xea   :  { %v865_v39 = vmul.f32 %v737_v28, %v737_v28  ;;  %v482_v40 = vpop.permute.xlu1 %481  ;;  %v478_v6 = vpop.permute.xlu0 %477  ;;  %v806_v47 = vmul.f32 %v365_v13, %v365_v13  ;;  %v805_v44 = vmul.f32 %v364_v9, %v364_v9  ;;  %v807_v53 = vmul.f32 %v366_v51, %v366_v51 }
  0xeb   :  { %v930_v41 = vsub.f32 %v802_v31, %v866_v20  ;;  %v740_v43 = vsub.f32 %v1239_v27, %v482_v40  ;;  %v1054_v7 = vadd.f32 %v1053_v37, %v991_v38  ;;  %v739_v46 = vsub.f32 %v1239_v27, %v478_v6 }
  0xec   :  { %v929_v42 = vsub.f32 %v801_v36, %v865_v39  ;;  %650 = vbcast.lane.b32.xlu1 %v1235_v19, 256  ;;  %273 = vbcast.lane.b32.xlu0 %v1228_v14, 256 }
  0xed   :  { %v868_v8 = vmul.f32 %v740_v43, %v740_v43  ;;  %v1055_v11 = vadd.f32 %v1054_v7, %v992_v18  ;;  %v867_v15 = vmul.f32 %v739_v46, %v739_v46  ;;  %v994_v23 = vmul.f32 %v930_v41, %v930_v41 }
  0xee   :  { %v993_v12 = vmul.f32 %v929_v42, %v929_v42  ;;  %v490_v16 = vpop.permute.xlu1 %489  ;;  %v486_v22 = vpop.permute.xlu0 %485  ;;  %v808_v7 = vmul.f32 %v367_v48, %v367_v48  ;;  %v369_v42 = vsub.f32 %v1237_v24, %v1292_v55  ;;  %v370_v55 = vsub.f32 %v1237_v24, %v1290_v54 }
  0xef   :  { %v932_v17 = vsub.f32 %v804_v45, %v868_v8  ;;  %v742_v21 = vsub.f32 %v1239_v27, %v490_v16  ;;  %v931_v26 = vsub.f32 %v803_v49, %v867_v15  ;;  %v741_v28 = vsub.f32 %v1239_v27, %v486_v22 }
  0xf0   :  { %v1056_v25 = vadd.f32 %v1055_v11, %v993_v12  ;;  %654 = vbcast.lane.b32.xlu1 %v1235_v19, 264  ;;  %277 = vbcast.lane.b32.xlu0 %v1228_v14, 264  ;;  %v368_v49 = vsub.f32 %v1237_v24, %v1284_v52  ;;  %v371_v52 = vsub.f32 %v1241_v29, %v1298_v57 }
  0xf1   :  { %v870_v31 = vmul.f32 %v742_v21, %v742_v21  ;;  %v995_v36 = vmul.f32 %v931_v26, %v931_v26  ;;  %v869_v37 = vmul.f32 %v741_v28, %v741_v28  ;;  %v996_v43 = vmul.f32 %v932_v17, %v932_v17 }
  0xf2   :  { %v1057_v20 = vadd.f32 %v1056_v25, %v994_v23  ;;  %v498_v38 = vpop.permute.xlu1 %497  ;;  %v494_v41 = vpop.permute.xlu0 %493  ;;  %v810_v23 = vmul.f32 %v369_v42, %v369_v42  ;;  %v809_v26 = vmul.f32 %v368_v49, %v368_v49  ;;  %v811_v54 = vmul.f32 %v370_v55, %v370_v55 }
  0xf3   :  { %v934_v39 = vsub.f32 %v806_v47, %v870_v31  ;;  %v744_v40 = vsub.f32 %v1239_v27, %v498_v38  ;;  %v933_v18 = vsub.f32 %v805_v44, %v869_v37  ;;  %v743_v50 = vsub.f32 %v1239_v27, %v494_v41 }
  0xf4   :  { %v1058_v6 = vadd.f32 %v1057_v20, %v995_v36  ;;  %658 = vbcast.lane.b32.xlu1 %v1235_v19, 272  ;;  %281 = vbcast.lane.b32.xlu0 %v1228_v14, 272  ;;  %v812_v57 = vmul.f32 %v371_v52, %v371_v52  ;;  %v372_v41 = vsub.f32 %v1241_v29, %v1296_v56 }
  0xf5   :  { %v872_v46 = vmul.f32 %v744_v40, %v744_v40  ;;  %v997_v13 = vmul.f32 %v933_v18, %v933_v18  ;;  %v871_v8 = vmul.f32 %v743_v50, %v743_v50  ;;  %v998_v16 = vmul.f32 %v934_v39, %v934_v39 }
  0xf6   :  { %v1059_v45 = vadd.f32 %v1058_v6, %v996_v43  ;;  %v506_v9 = vpop.permute.xlu1 %505  ;;  %v502_v15 = vpop.permute.xlu0 %501  ;;  %v373_v39 = vsub.f32 %v1241_v29, %v1304_v59  ;;  %v374_v59 = vsub.f32 %v1241_v29, %v1302_v58  ;;  %v375_v56 = vsub.f32 %v1241_v29, %v1310_v61 }
  0xf7   :  { %v936_v11 = vsub.f32 %v808_v7, %v872_v46  ;;  %v746_v12 = vsub.f32 %v1239_v27, %v506_v9  ;;  %v935_v21 = vsub.f32 %v807_v53, %v871_v8  ;;  %v745_v22 = vsub.f32 %v1239_v27, %v502_v15 }
  0xf8   :  { %v1060_v17 = vadd.f32 %v1059_v45, %v997_v13  ;;  %662 = vbcast.lane.b32.xlu1 %v1235_v19, 280  ;;  %285 = vbcast.lane.b32.xlu0 %v1228_v14, 280  ;;  %v814_v13 = vmul.f32 %v373_v39, %v373_v39  ;;  %v813_v9 = vmul.f32 %v372_v41, %v372_v41 }
  0xf9   :  { %v874_v25 = vmul.f32 %v746_v12, %v746_v12  ;;  %v999_v51 = vmul.f32 %v935_v21, %v935_v21  ;;  %v873_v47 = vmul.f32 %v745_v22, %v745_v22  ;;  %v1000_v36 = vmul.f32 %v936_v11, %v936_v11 }
  0xfa   :  { %v1061_v28 = vadd.f32 %v1060_v17, %v998_v16  ;;  %v517_v48 = vpop.permute.xlu1 %516  ;;  %v510_v20 = vpop.permute.xlu0 %509  ;;  %v815_v61 = vmul.f32 %v374_v59, %v374_v59  ;;  %v381_v59 = vsub.f32 %v1241_v29, %v1328_v3  ;;  %v382_v3 = vsub.f32 %v1241_v29, %v1326_v2 }
  0xfb   :  { %v938_v31 = vsub.f32 %v810_v23, %v874_v25  ;;  %v748_v44 = vsub.f32 %v1245_v32, %v517_v48  ;;  %v937_v38 = vsub.f32 %v809_v26, %v873_v47  ;;  %v747_v24 = vsub.f32 %v1239_v27, %v510_v20 }
  0xfc   :  { %v1062_v37 = vadd.f32 %v1061_v28, %v999_v51  ;;  %666 = vbcast.lane.b32.xlu1 %v1235_v19, 288  ;;  %289 = vbcast.lane.b32.xlu0 %v1228_v14, 288  ;;  %v816_v25 = vmul.f32 %v375_v56, %v375_v56  ;;  %v377_v26 = vsub.f32 %v1241_v29, %v1316_v63 }
  0xfd   :  { %v876_v40 = vmul.f32 %v748_v44, %v748_v44  ;;  %v1001_v6 = vmul.f32 %v937_v38, %v937_v38  ;;  %v875_v18 = vmul.f32 %v747_v24, %v747_v24  ;;  %v1002_v42 = vmul.f32 %v938_v31, %v938_v31 }
  0xfe   :  { %v1063_v43 = vadd.f32 %v1062_v37, %v1000_v36  ;;  %v525_v50 = vpop.permute.xlu1 %524  ;;  %v521_v7 = vpop.permute.xlu0 %520  ;;  %v376_v51 = vsub.f32 %v1241_v29, %v1308_v60  ;;  %v378_v63 = vsub.f32 %v1241_v29, %v1314_v62  ;;  %v818_v39 = vmul.f32 %v377_v26, %v377_v26 }
  0xff   :  { %v940_v53 = vsub.f32 %v812_v57, %v876_v40  ;;  %v750_v27 = vsub.f32 %v1245_v32, %v525_v50  ;;  %v939_v49 = vsub.f32 %v811_v54, %v875_v18  ;;  %v749_v45 = vsub.f32 %v1245_v32, %v521_v7 }
 0x100   :  { %v1064_v46 = vadd.f32 %v1063_v43, %v1001_v6  ;;  %670 = vbcast.lane.b32.xlu1 %v1235_v19, 296  ;;  %293 = vbcast.lane.b32.xlu0 %v1228_v14, 296  ;;  %v379_v60 = vsub.f32 %v1241_v29, %v1322_v1  ;;  %v817_v41 = vmul.f32 %v376_v51, %v376_v51 }
 0x101   :  { %v878_v8 = vmul.f32 %v750_v27, %v750_v27  ;;  %v1003_v12 = vmul.f32 %v939_v49, %v939_v49  ;;  %v877_v15 = vmul.f32 %v749_v45, %v749_v45  ;;  %v1004_v55 = vmul.f32 %v940_v53, %v940_v53 }
 0x102   :  { %v1065_v11 = vadd.f32 %v1064_v46, %v1002_v42  ;;  %v533_v16 = vpop.permute.xlu1 %532  ;;  %v529_v22 = vpop.permute.xlu0 %528  ;;  %v819_v1 = vmul.f32 %v378_v63, %v378_v63  ;;  %v820_v45 = vmul.f32 %v379_v60, %v379_v60  ;;  %v380_v56 = vsub.f32 %v1241_v29, %v1320_v0 }
 0x103   :  { %v942_v17 = vsub.f32 %v814_v13, %v878_v8  ;;  %v752_v21 = vsub.f32 %v1245_v32, %v533_v16  ;;  %v941_v52 = vsub.f32 %v813_v9, %v877_v15  ;;  %v751_v58 = vsub.f32 %v1245_v32, %v529_v22 }
 0x104   :  { %v1066_v23 = vadd.f32 %v1065_v11, %v1003_v12  ;;  %674 = vbcast.lane.b32.xlu1 %v1235_v19, 304  ;;  %297 = vbcast.lane.b32.xlu0 %v1228_v14, 304  ;;  %v383_v0 = vsub.f32 %v1241_v29, %v1334_v5  ;;  %v823_v5 = vmul.f32 %v382_v3, %v382_v3 }
 0x105   :  { %v880_v28 = vmul.f32 %v752_v21, %v752_v21  ;;  %v1005_v48 = vmul.f32 %v941_v52, %v941_v52  ;;  %v879_v31 = vmul.f32 %v751_v58, %v751_v58  ;;  %v1006_v38 = vmul.f32 %v942_v17, %v942_v17 }
 0x106   :  { %v1067_v47 = vadd.f32 %v1066_v23, %v1004_v55  ;;  %v541_v44 = vpop.permute.xlu1 %540  ;;  %v537_v37 = vpop.permute.xlu0 %536  ;;  %v822_v52 = vmul.f32 %v381_v59, %v381_v59 }
 0x107   :  { %v944_v20 = vsub.f32 %v816_v25, %v880_v28  ;;  %v754_v36 = vsub.f32 %v1245_v32, %v541_v44  ;;  %v943_v54 = vsub.f32 %v815_v61, %v879_v31  ;;  %v753_v57 = vsub.f32 %v1245_v32, %v537_v37 }
 0x108   :  { %v1068_v24 = vadd.f32 %v1067_v47, %v1005_v48  ;;  %678 = vbcast.lane.b32.xlu1 %v1235_v19, 312  ;;  %301 = vbcast.lane.b32.xlu0 %v1228_v14, 312  ;;  %v821_v61 = vmul.f32 %v380_v56, %v380_v56  ;;  %v824_v37 = vmul.f32 %v383_v0, %v383_v0 }
 0x109   :  { %v882_v40 = vmul.f32 %v754_v36, %v754_v36  ;;  %v1007_v6 = vmul.f32 %v943_v54, %v943_v54  ;;  %v881_v18 = vmul.f32 %v753_v57, %v753_v57  ;;  %v1008_v42 = vmul.f32 %v944_v20, %v944_v20 }
 0x10a   :  { %v1069_v43 = vadd.f32 %v1068_v24, %v1006_v38  ;;  %v549_v50 = vpop.permute.xlu1 %548  ;;  %v545_v7 = vpop.permute.xlu0 %544  ;;  %v384_v24 = vsub.f32 %v1241_v29, %v1332_v4 }
 0x10b   :  { %v946_v53 = vsub.f32 %v818_v39, %v882_v40  ;;  %v756_v27 = vsub.f32 %v1245_v32, %v549_v50  ;;  %v945_v49 = vsub.f32 %v817_v41, %v881_v18  ;;  %v755_v62 = vsub.f32 %v1245_v32, %v545_v7 }
 0x10c   :  { %v1070_v46 = vadd.f32 %v1069_v43, %v1007_v6  ;;  %682 = vbcast.lane.b32.xlu1 %v1235_v19, 320  ;;  %305 = vbcast.lane.b32.xlu0 %v1228_v14, 320  ;;  %v825_v4 = vmul.f32 %v384_v24, %v384_v24 }
 0x10d   :  { %v884_v13 = vmul.f32 %v756_v27, %v756_v27  ;;  %v1009_v9 = vmul.f32 %v945_v49, %v945_v49  ;;  %v883_v11 = vmul.f32 %v755_v62, %v755_v62  ;;  %v1010_v21 = vmul.f32 %v946_v53, %v946_v53 }
 0x10e   :  { %v1071_v8 = vadd.f32 %v1070_v46, %v1008_v42  ;;  %v557_v12 = vpop.permute.xlu1 %556  ;;  %v553_v17 = vpop.permute.xlu0 %552  ;;  %v826_v53 = vmul.f32 %v1341_v10, %v1341_v10 }
 0x10f   :  { %v948_v15 = vsub.f32 %v820_v45, %v884_v13  ;;  %v758_v16 = vsub.f32 %v1245_v32, %v557_v12  ;;  %v947_v55 = vsub.f32 %v819_v1, %v883_v11  ;;  %v757_v23 = vsub.f32 %v1245_v32, %v553_v17 }
 0x110   :  { %v1072_v22 = vadd.f32 %v1071_v8, %v1009_v9  ;;  %686 = vbcast.lane.b32.xlu1 %v1235_v19, 328  ;;  %309 = vbcast.lane.b32.xlu0 %v1228_v14, 328 }
 0x111   :  { %v886_v58 = vmul.f32 %v758_v16, %v758_v16  ;;  %v1011_v26 = vmul.f32 %v947_v55, %v947_v55  ;;  %v885_v28 = vmul.f32 %v757_v23, %v757_v23  ;;  %v1012_v44 = vmul.f32 %v948_v15, %v948_v15 }
 0x112   :  { %v1073_v25 = vadd.f32 %v1072_v22, %v1010_v21  ;;  %v565_v51 = vpop.permute.xlu1 %564  ;;  %v561_v31 = vpop.permute.xlu0 %560 }
 0x113   :  { %v950_v47 = vsub.f32 %v822_v52, %v886_v58  ;;  %v760_v48 = vsub.f32 %v1245_v32, %v565_v51  ;;  %v949_v36 = vsub.f32 %v821_v61, %v885_v28  ;;  %v759_v2 = vsub.f32 %v1245_v32, %v561_v31 }
 0x114   :  { %v1074_v20 = vadd.f32 %v1073_v25, %v1011_v26  ;;  %690 = vbcast.lane.b32.xlu1 %v1235_v19, 336  ;;  %313 = vbcast.lane.b32.xlu0 %v1228_v14, 336 }
 0x115   :  { %v888_v38 = vmul.f32 %v760_v48, %v760_v48  ;;  %v1013_v57 = vmul.f32 %v949_v36, %v949_v36  ;;  %v887_v63 = vmul.f32 %v759_v2, %v759_v2  ;;  %v1014_v43 = vmul.f32 %v950_v47, %v950_v47 }
 0x116   :  { %v1075_v54 = vadd.f32 %v1074_v20, %v1012_v44  ;;  %v573_v39 = vpop.permute.xlu1 %572  ;;  %v569_v41 = vpop.permute.xlu0 %568 }
 0x117   :  { %v952_v60 = vsub.f32 %v824_v37, %v888_v38  ;;  %v762_v40 = vsub.f32 %v1245_v32, %v573_v39  ;;  %v951_v18 = vsub.f32 %v823_v5, %v887_v63  ;;  %v761_v50 = vsub.f32 %v1245_v32, %v569_v41 }
 0x118   :  { %v1076_v6 = vadd.f32 %v1075_v54, %v1013_v57  ;;  %694 = vbcast.lane.b32.xlu1 %v1235_v19, 344  ;;  %317 = vbcast.lane.b32.xlu0 %v1228_v14, 344 }
 0x119   :  { %v890_v27 = vmul.f32 %v762_v40, %v762_v40  ;;  %v1015_v42 = vmul.f32 %v951_v18, %v951_v18  ;;  %v889_v46 = vmul.f32 %v761_v50, %v761_v50  ;;  %v1016_v59 = vmul.f32 %v952_v60, %v952_v60 }
 0x11a   :  { %v1077_v7 = vadd.f32 %v1076_v6, %v1014_v43  ;;  %v577_v49 = vpop.permute.xlu1 %576  ;;  %v200_v45 = vpop.permute.xlu0 %199 }
 0x11b   :  { %v954_v62 = vsub.f32 %v826_v53, %v890_v27  ;;  %v763_v1 = vsub.f32 %v1245_v32, %v577_v49  ;;  %v953_v56 = vsub.f32 %v825_v4, %v889_v46  ;;  %v386_v8 = vsub.f32 %v1241_v29, %v200_v45 }
 0x11c   :  { %v1078_v13 = vadd.f32 %v1077_v7, %v1015_v42  ;;  %698 = vbcast.lane.b32.xlu1 %v1235_v19, 352  ;;  %321 = vbcast.lane.b32.xlu0 %v1228_v14, 352 }
 0x11d   :  { %v891_v10 = vmul.f32 %v763_v1, %v763_v1  ;;  %v1017_v11 = vmul.f32 %v953_v56, %v953_v56  ;;  %v827_v12 = vmul.f32 %v386_v8, %v386_v8  ;;  %v1018_v21 = vmul.f32 %v954_v62, %v954_v62 }
 0x11e   :  { %v1079_v9 = vadd.f32 %v1078_v13, %v1016_v59  ;;  %v584_v15 = vpop.permute.xlu1 %583  ;;  %v207_v17 = vpop.permute.xlu0 %206 }
 0x11f   :  { %v764_v16 = vsub.f32 %v1247_v33, %v584_v15  ;;  %v955_v22 = vsub.f32 %v827_v12, %v891_v10  ;;  %v387_v55 = vsub.f32 %v1243_v30, %v207_v17 }
 0x120   :  { %v1080_v32 = vadd.f32 %v1079_v9, %v1017_v11  ;;  %702 = vbcast.lane.b32.xlu1 %v1235_v19, 360  ;;  %325 = vbcast.lane.b32.xlu0 %v1228_v14, 360 }
 0x121   :  { %v892_v29 = vmul.f32 %v764_v16, %v764_v16  ;;  %v1019_v3 = vmul.f32 %v955_v22, %v955_v22  ;;  %v828_v52 = vmul.f32 %v387_v55, %v387_v55 }
 0x122   :  { %v1081_v23 = vadd.f32 %v1080_v32, %v1018_v21  ;;  %v588_v0 = vpop.permute.xlu1 %587  ;;  %v211_v61 = vpop.permute.xlu0 %210 }
 0x123   :  { %v765_v58 = vsub.f32 %v1247_v33, %v588_v0  ;;  %v956_v26 = vsub.f32 %v828_v52, %v892_v29  ;;  %v388_v28 = vsub.f32 %v1243_v30, %v211_v61 }
 0x124   :  { %v1082_v25 = vadd.f32 %v1081_v23, %v1019_v3  ;;  %706 = vbcast.lane.b32.xlu1 %v1235_v19, 368  ;;  %329 = vbcast.lane.b32.xlu0 %v1228_v14, 368 }
 0x125   :  { %v893_v51 = vmul.f32 %v765_v58, %v765_v58  ;;  %v1020_v47 = vmul.f32 %v956_v26, %v956_v26  ;;  %v829_v48 = vmul.f32 %v388_v28, %v388_v28 }
 0x126   :  { %v592_v31 = vpop.permute.xlu1 %591  ;;  %v215_v20 = vpop.permute.xlu0 %214 }
 0x127   :  { %v766_v44 = vsub.f32 %v1247_v33, %v592_v31  ;;  %v1083_v36 = vadd.f32 %v1082_v25, %v1020_v47  ;;  %v957_v2 = vsub.f32 %v829_v48, %v893_v51  ;;  %v389_v5 = vsub.f32 %v1243_v30, %v215_v20 }
 0x128   :  { %710 = vbcast.lane.b32.xlu1 %v1235_v19, 376  ;;  %333 = vbcast.lane.b32.xlu0 %v1228_v14, 376 }
 0x129   :  { %v894_v37 = vmul.f32 %v766_v44, %v766_v44  ;;  %v1021_v38 = vmul.f32 %v957_v2, %v957_v2  ;;  %v830_v24 = vmul.f32 %v389_v5, %v389_v5 }
 0x12a   :  { %v596_v54 = vpop.permute.xlu1 %595  ;;  %v219_v63 = vpop.permute.xlu0 %218 }
 0x12b   :  { %v767_v57 = vsub.f32 %v1247_v33, %v596_v54  ;;  %v1084_v39 = vadd.f32 %v1083_v36, %v1021_v38  ;;  %v958_v60 = vsub.f32 %v830_v24, %v894_v37  ;;  %v390_v40 = vsub.f32 %v1243_v30, %v219_v63 }
 0x12d   :  { %v895_v41 = vmul.f32 %v767_v57, %v767_v57  ;;  %v1022_v43 = vmul.f32 %v958_v60, %v958_v60  ;;  %v831_v6 = vmul.f32 %v390_v40, %v390_v40 }
 0x12e   :  { %v600_v18 = vpop.permute.xlu1 %599  ;;  %v223_v19 = vpop.permute.xlu0 %222 }
 0x12f   :  { %v768_v50 = vsub.f32 %v1247_v33, %v600_v18  ;;  %v1085_v53 = vadd.f32 %v1084_v39, %v1022_v43  ;;  %v959_v27 = vsub.f32 %v831_v6, %v895_v41  ;;  %v391_v14 = vsub.f32 %v1243_v30, %v223_v19 }
 0x131   :  { %v896_v4 = vmul.f32 %v768_v50, %v768_v50  ;;  %v1023_v7 = vmul.f32 %v959_v27, %v959_v27  ;;  %v832_v42 = vmul.f32 %v391_v14, %v391_v14 }
 0x132   :  { %v604_v46 = vpop.permute.xlu1 %603  ;;  %v227_v62 = vpop.permute.xlu0 %226 }
 0x133   :  { %v769_v49 = vsub.f32 %v1247_v33, %v604_v46  ;;  %v1086_v1 = vadd.f32 %v1085_v53, %v1023_v7  ;;  %v960_v45 = vsub.f32 %v832_v42, %v896_v4  ;;  %v392_v59 = vsub.f32 %v1243_v30, %v227_v62 }
 0x135   :  { %v897_v13 = vmul.f32 %v769_v49, %v769_v49  ;;  %v1024_v56 = vmul.f32 %v960_v45, %v960_v45  ;;  %v833_v8 = vmul.f32 %v392_v59, %v392_v59 }
 0x136   :  { %v608_v10 = vpop.permute.xlu1 %607  ;;  %v231_v11 = vpop.permute.xlu0 %230 }
 0x137   :  { %v770_v9 = vsub.f32 %v1247_v33, %v608_v10  ;;  %v1087_v12 = vadd.f32 %v1086_v1, %v1024_v56  ;;  %v961_v15 = vsub.f32 %v833_v8, %v897_v13  ;;  %v393_v16 = vsub.f32 %v1243_v30, %v231_v11 }
 0x139   :  { %v898_v17 = vmul.f32 %v770_v9, %v770_v9  ;;  %v1025_v21 = vmul.f32 %v961_v15, %v961_v15  ;;  %v834_v32 = vmul.f32 %v393_v16, %v393_v16 }
 0x13a   :  { %v612_v22 = vpop.permute.xlu1 %611  ;;  %v235_v29 = vpop.permute.xlu0 %234 }
 0x13b   :  { %v771_v55 = vsub.f32 %v1247_v33, %v612_v22  ;;  %v1088_v23 = vadd.f32 %v1087_v12, %v1025_v21  ;;  %v962_v3 = vsub.f32 %v834_v32, %v898_v17  ;;  %v394_v52 = vsub.f32 %v1243_v30, %v235_v29 }
 0x13d   :  { %v899_v0 = vmul.f32 %v771_v55, %v771_v55  ;;  %v1026_v58 = vmul.f32 %v962_v3, %v962_v3  ;;  %v835_v61 = vmul.f32 %v394_v52, %v394_v52 }
 0x13e   :  { %v616_v25 = vpop.permute.xlu1 %615  ;;  %v239_v28 = vpop.permute.xlu0 %238 }
 0x13f   :  { %v772_v26 = vsub.f32 %v1247_v33, %v616_v25  ;;  %v1089_v51 = vadd.f32 %v1088_v23, %v1026_v58  ;;  %v963_v47 = vsub.f32 %v835_v61, %v899_v0  ;;  %v395_v48 = vsub.f32 %v1243_v30, %v239_v28 }
 0x141   :  { %v900_v31 = vmul.f32 %v772_v26, %v772_v26  ;;  %v1027_v44 = vmul.f32 %v963_v47, %v963_v47  ;;  %v836_v20 = vmul.f32 %v395_v48, %v395_v48 }
 0x142   :  { %v620_v36 = vpop.permute.xlu1 %619  ;;  %v243_v5 = vpop.permute.xlu0 %242 }
 0x143   :  { %v773_v2 = vsub.f32 %v1247_v33, %v620_v36  ;;  %v1090_v37 = vadd.f32 %v1089_v51, %v1027_v44  ;;  %v964_v38 = vsub.f32 %v836_v20, %v900_v31  ;;  %v396_v24 = vsub.f32 %v1243_v30, %v243_v5 }
 0x145   :  { %v901_v54 = vmul.f32 %v773_v2, %v773_v2  ;;  %v1028_v57 = vmul.f32 %v964_v38, %v964_v38  ;;  %v837_v63 = vmul.f32 %v396_v24, %v396_v24 }
 0x146   :  { %v624_v39 = vpop.permute.xlu1 %623  ;;  %v247_v40 = vpop.permute.xlu0 %246 }
 0x147   :  { %v774_v60 = vsub.f32 %v1247_v33, %v624_v39  ;;  %v1091_v41 = vadd.f32 %v1090_v37, %v1028_v57  ;;  %v965_v43 = vsub.f32 %v837_v63, %v901_v54  ;;  %v397_v6 = vsub.f32 %v1243_v30, %v247_v40 }
 0x149   :  { %v902_v18 = vmul.f32 %v774_v60, %v774_v60  ;;  %v1029_v50 = vmul.f32 %v965_v43, %v965_v43  ;;  %v838_v19 = vmul.f32 %v397_v6, %v397_v6 }
 0x14a   :  { %v628_v53 = vpop.permute.xlu1 %627  ;;  %v251_v14 = vpop.permute.xlu0 %250 }
 0x14b   :  { %v775_v27 = vsub.f32 %v1247_v33, %v628_v53  ;;  %v1092_v4 = vadd.f32 %v1091_v41, %v1029_v50  ;;  %v966_v7 = vsub.f32 %v838_v19, %v902_v18  ;;  %v398_v42 = vsub.f32 %v1243_v30, %v251_v14 }
 0x14d   :  { %v903_v46 = vmul.f32 %v775_v27, %v775_v27  ;;  %v1030_v49 = vmul.f32 %v966_v7, %v966_v7  ;;  %v839_v62 = vmul.f32 %v398_v42, %v398_v42 }
 0x14e   :  { %v632_v1 = vpop.permute.xlu1 %631  ;;  %v255_v59 = vpop.permute.xlu0 %254 }
 0x14f   :  { %v776_v45 = vsub.f32 %v1247_v33, %v632_v1  ;;  %v1093_v13 = vadd.f32 %v1092_v4, %v1030_v49  ;;  %v967_v56 = vsub.f32 %v839_v62, %v903_v46  ;;  %v399_v8 = vsub.f32 %v1243_v30, %v255_v59 }
 0x151   :  { %v904_v10 = vmul.f32 %v776_v45, %v776_v45  ;;  %v1031_v9 = vmul.f32 %v967_v56, %v967_v56  ;;  %v840_v11 = vmul.f32 %v399_v8, %v399_v8 }
 0x152   :  { %v636_v12 = vpop.permute.xlu1 %635  ;;  %v259_v16 = vpop.permute.xlu0 %258 }
 0x153   :  { %v777_v15 = vsub.f32 %v1247_v33, %v636_v12  ;;  %v1094_v17 = vadd.f32 %v1093_v13, %v1031_v9  ;;  %v968_v21 = vsub.f32 %v840_v11, %v904_v10  ;;  %v400_v32 = vsub.f32 %v1243_v30, %v259_v16 }
 0x155   :  { %v905_v22 = vmul.f32 %v777_v15, %v777_v15  ;;  %v1032_v55 = vmul.f32 %v968_v21, %v968_v21  ;;  %v841_v29 = vmul.f32 %v400_v32, %v400_v32 }
 0x156   :  { %v640_v23 = vpop.permute.xlu1 %639  ;;  %v263_v52 = vpop.permute.xlu0 %262 }
 0x157   :  { %v778_v3 = vsub.f32 %v1247_v33, %v640_v23  ;;  %v1095_v0 = vadd.f32 %v1094_v17, %v1032_v55  ;;  %v969_v58 = vsub.f32 %v841_v29, %v905_v22  ;;  %v401_v61 = vsub.f32 %v1243_v30, %v263_v52 }
 0x159   :  { %v906_v25 = vmul.f32 %v778_v3, %v778_v3  ;;  %v1033_v26 = vmul.f32 %v969_v58, %v969_v58  ;;  %v842_v28 = vmul.f32 %v401_v61, %v401_v61 }
 0x15a   :  { %v644_v51 = vpop.permute.xlu1 %643  ;;  %v267_v48 = vpop.permute.xlu0 %266 }
 0x15b   :  { %v779_v47 = vsub.f32 %v1247_v33, %v644_v51  ;;  %v1096_v31 = vadd.f32 %v1095_v0, %v1033_v26  ;;  %v970_v44 = vsub.f32 %v842_v28, %v906_v25  ;;  %v402_v20 = vsub.f32 %v1243_v30, %v267_v48 }
 0x15d   :  { %v907_v36 = vmul.f32 %v779_v47, %v779_v47  ;;  %v1034_v2 = vmul.f32 %v970_v44, %v970_v44  ;;  %v843_v5 = vmul.f32 %v402_v20, %v402_v20 }
 0x15e   :  { %v651_v37 = vpop.permute.xlu1 %650  ;;  %v274_v24 = vpop.permute.xlu0 %273 }
 0x15f   :  { %v780_v38 = vsub.f32 %v1251_v35, %v651_v37  ;;  %v1097_v54 = vadd.f32 %v1096_v31, %v1034_v2  ;;  %v971_v57 = vsub.f32 %v843_v5, %v907_v36  ;;  %v403_v63 = vsub.f32 %v1249_v34, %v274_v24 }
 0x161   :  { %v908_v39 = vmul.f32 %v780_v38, %v780_v38  ;;  %v1035_v60 = vmul.f32 %v971_v57, %v971_v57  ;;  %v844_v40 = vmul.f32 %v403_v63, %v403_v63 }
 0x162   :  { %v655_v33 = vpop.permute.xlu1 %654  ;;  %v278_v43 = vpop.permute.xlu0 %277 }
 0x163   :  { %v781_v41 = vsub.f32 %v1251_v35, %v655_v33  ;;  %v1098_v6 = vadd.f32 %v1097_v54, %v1035_v60  ;;  %v972_v30 = vsub.f32 %v844_v40, %v908_v39  ;;  %v404_v18 = vsub.f32 %v1249_v34, %v278_v43 }
 0x165   :  { %v909_v50 = vmul.f32 %v781_v41, %v781_v41  ;;  %v1036_v19 = vmul.f32 %v972_v30, %v972_v30  ;;  %v845_v53 = vmul.f32 %v404_v18, %v404_v18 }
 0x166   :  { %v659_v27 = vpop.permute.xlu1 %658  ;;  %v282_v4 = vpop.permute.xlu0 %281 }
 0x167   :  { %v782_v14 = vsub.f32 %v1251_v35, %v659_v27  ;;  %v1099_v7 = vadd.f32 %v1098_v6, %v1036_v19  ;;  %v973_v42 = vsub.f32 %v845_v53, %v909_v50  ;;  %v405_v46 = vsub.f32 %v1249_v34, %v282_v4 }
 0x169   :  { %v910_v49 = vmul.f32 %v782_v14, %v782_v14  ;;  %v1037_v62 = vmul.f32 %v973_v42, %v973_v42  ;;  %v846_v1 = vmul.f32 %v405_v46, %v405_v46 }
 0x16a   :  { %v663_v45 = vpop.permute.xlu1 %662  ;;  %v286_v13 = vpop.permute.xlu0 %285 }
 0x16b   :  { %v783_v59 = vsub.f32 %v1251_v35, %v663_v45  ;;  %v1100_v56 = vadd.f32 %v1099_v7, %v1037_v62  ;;  %v974_v8 = vsub.f32 %v846_v1, %v910_v49  ;;  %v406_v10 = vsub.f32 %v1249_v34, %v286_v13 }
 0x16d   :  { %v911_v9 = vmul.f32 %v783_v59, %v783_v59  ;;  %v1038_v11 = vmul.f32 %v974_v8, %v974_v8  ;;  %v847_v12 = vmul.f32 %v406_v10, %v406_v10 }
 0x16e   :  { %v667_v15 = vpop.permute.xlu1 %666  ;;  %v290_v17 = vpop.permute.xlu0 %289 }
 0x16f   :  { %v784_v16 = vsub.f32 %v1251_v35, %v667_v15  ;;  %v1101_v21 = vadd.f32 %v1100_v56, %v1038_v11  ;;  %v975_v32 = vsub.f32 %v847_v12, %v911_v9  ;;  %v407_v22 = vsub.f32 %v1249_v34, %v290_v17 }
 0x171   :  { %v912_v55 = vmul.f32 %v784_v16, %v784_v16  ;;  %v1039_v29 = vmul.f32 %v975_v32, %v975_v32  ;;  %v848_v23 = vmul.f32 %v407_v22, %v407_v22 }
 0x172   :  { %v671_v3 = vpop.permute.xlu1 %670  ;;  %v294_v0 = vpop.permute.xlu0 %293 }
 0x173   :  { %v785_v52 = vsub.f32 %v1251_v35, %v671_v3  ;;  %v1102_v58 = vadd.f32 %v1101_v21, %v1039_v29  ;;  %v976_v61 = vsub.f32 %v848_v23, %v912_v55  ;;  %v408_v25 = vsub.f32 %v1249_v34, %v294_v0 }
 0x175   :  { %v913_v26 = vmul.f32 %v785_v52, %v785_v52  ;;  %v1040_v28 = vmul.f32 %v976_v61, %v976_v61  ;;  %v849_v51 = vmul.f32 %v408_v25, %v408_v25 }
 0x176   :  { %v675_v47 = vpop.permute.xlu1 %674  ;;  %v298_v31 = vpop.permute.xlu0 %297 }
 0x177   :  { %v786_v48 = vsub.f32 %v1251_v35, %v675_v47  ;;  %v1103_v44 = vadd.f32 %v1102_v58, %v1040_v28  ;;  %v977_v20 = vsub.f32 %v849_v51, %v913_v26  ;;  %v409_v36 = vsub.f32 %v1249_v34, %v298_v31 }
 0x179   :  { %v914_v2 = vmul.f32 %v786_v48, %v786_v48  ;;  %v1041_v5 = vmul.f32 %v977_v20, %v977_v20  ;;  %v850_v37 = vmul.f32 %v409_v36, %v409_v36 }
 0x17a   :  { %v679_v38 = vpop.permute.xlu1 %678  ;;  %v302_v54 = vpop.permute.xlu0 %301 }
 0x17b   :  { %v787_v24 = vsub.f32 %v1251_v35, %v679_v38  ;;  %v1104_v57 = vadd.f32 %v1103_v44, %v1041_v5  ;;  %v978_v63 = vsub.f32 %v850_v37, %v914_v2  ;;  %v410_v39 = vsub.f32 %v1249_v34, %v302_v54 }
 0x17d   :  { %v915_v60 = vmul.f32 %v787_v24, %v787_v24  ;;  %v1042_v40 = vmul.f32 %v978_v63, %v978_v63  ;;  %v851_v33 = vmul.f32 %v410_v39, %v410_v39 }
 0x17e   :  { %v683_v41 = vpop.permute.xlu1 %682  ;;  %v306_v6 = vpop.permute.xlu0 %305 }
 0x17f   :  { %v788_v43 = vsub.f32 %v1251_v35, %v683_v41  ;;  %v1105_v30 = vadd.f32 %v1104_v57, %v1042_v40  ;;  %v979_v18 = vsub.f32 %v851_v33, %v915_v60  ;;  %v411_v50 = vsub.f32 %v1249_v34, %v306_v6 }
 0x181   :  { %v916_v19 = vmul.f32 %v788_v43, %v788_v43  ;;  %v1043_v53 = vmul.f32 %v979_v18, %v979_v18  ;;  %v852_v27 = vmul.f32 %v411_v50, %v411_v50 }
 0x182   :  { %v687_v14 = vpop.permute.xlu1 %686  ;;  %v310_v7 = vpop.permute.xlu0 %309 }
 0x183   :  { %v789_v4 = vsub.f32 %v1251_v35, %v687_v14  ;;  %v1106_v42 = vadd.f32 %v1105_v30, %v1043_v53  ;;  %v980_v46 = vsub.f32 %v852_v27, %v916_v19  ;;  %v412_v49 = vsub.f32 %v1249_v34, %v310_v7 }
 0x185   :  { %v917_v62 = vmul.f32 %v789_v4, %v789_v4  ;;  %v1044_v1 = vmul.f32 %v980_v46, %v980_v46  ;;  %v853_v45 = vmul.f32 %v412_v49, %v412_v49 }
 0x186   :  { %v691_v59 = vpop.permute.xlu1 %690  ;;  %v314_v56 = vpop.permute.xlu0 %313 }
 0x187   :  { %v790_v13 = vsub.f32 %v1251_v35, %v691_v59  ;;  %v1107_v8 = vadd.f32 %v1106_v42, %v1044_v1  ;;  %v981_v10 = vsub.f32 %v853_v45, %v917_v62  ;;  %v413_v9 = vsub.f32 %v1249_v34, %v314_v56 }
 0x189   :  { %v918_v11 = vmul.f32 %v790_v13, %v790_v13  ;;  %v1045_v12 = vmul.f32 %v981_v10, %v981_v10  ;;  %v854_v15 = vmul.f32 %v413_v9, %v413_v9 }
 0x18a   :  { %v695_v16 = vpop.permute.xlu1 %694  ;;  %v318_v21 = vpop.permute.xlu0 %317 }
 0x18b   :  { %v791_v17 = vsub.f32 %v1251_v35, %v695_v16  ;;  %v1108_v32 = vadd.f32 %v1107_v8, %v1045_v12  ;;  %v982_v22 = vsub.f32 %v854_v15, %v918_v11  ;;  %v414_v55 = vsub.f32 %v1249_v34, %v318_v21 }
 0x18d   :  { %v919_v29 = vmul.f32 %v791_v17, %v791_v17  ;;  %v1046_v23 = vmul.f32 %v982_v22, %v982_v22  ;;  %v855_v3 = vmul.f32 %v414_v55, %v414_v55 }
 0x18e   :  { %v699_v52 = vpop.permute.xlu1 %698  ;;  %v322_v58 = vpop.permute.xlu0 %321 }
 0x18f   :  { %v792_v0 = vsub.f32 %v1251_v35, %v699_v52  ;;  %v1109_v61 = vadd.f32 %v1108_v32, %v1046_v23  ;;  %v983_v25 = vsub.f32 %v855_v3, %v919_v29  ;;  %v415_v26 = vsub.f32 %v1249_v34, %v322_v58 }
 0x191   :  { %v920_v28 = vmul.f32 %v792_v0, %v792_v0  ;;  %v1047_v51 = vmul.f32 %v983_v25, %v983_v25  ;;  %v856_v47 = vmul.f32 %v415_v26, %v415_v26 }
 0x192   :  { %v703_v48 = vpop.permute.xlu1 %702  ;;  %v326_v44 = vpop.permute.xlu0 %325 }
 0x193   :  { %v793_v31 = vsub.f32 %v1251_v35, %v703_v48  ;;  %v1110_v20 = vadd.f32 %v1109_v61, %v1047_v51  ;;  %v984_v36 = vsub.f32 %v856_v47, %v920_v28  ;;  %v416_v2 = vsub.f32 %v1249_v34, %v326_v44 }
 0x195   :  { %v921_v5 = vmul.f32 %v793_v31, %v793_v31  ;;  %v1048_v37 = vmul.f32 %v984_v36, %v984_v36  ;;  %v857_v38 = vmul.f32 %v416_v2, %v416_v2 }
 0x196   :  { %v707_v24 = vpop.permute.xlu1 %706  ;;  %v330_v57 = vpop.permute.xlu0 %329 }
 0x197   :  { %v794_v54 = vsub.f32 %v1251_v35, %v707_v24  ;;  %v1111_v63 = vadd.f32 %v1110_v20, %v1048_v37  ;;  %v985_v39 = vsub.f32 %v857_v38, %v921_v5  ;;  %v417_v60 = vsub.f32 %v1249_v34, %v330_v57 }
 0x199   :  { %v922_v40 = vmul.f32 %v794_v54, %v794_v54  ;;  %v1049_v33 = vmul.f32 %v985_v39, %v985_v39  ;;  %v858_v41 = vmul.f32 %v417_v60, %v417_v60 }
 0x19a   :  { %v711_v43 = vpop.permute.xlu1 %710  ;;  %v334_v30 = vpop.permute.xlu0 %333 }
 0x19b   :  { %v795_v6 = vsub.f32 %v1251_v35, %v711_v43  ;;  %v1112_v18 = vadd.f32 %v1111_v63, %v1049_v33  ;;  %v986_v50 = vsub.f32 %v858_v41, %v922_v40  ;;  %v418_v19 = vsub.f32 %v1249_v34, %v334_v30 }
 0x19d   :  { %v923_v53 = vmul.f32 %v795_v6, %v795_v6  ;;  %v1050_v27 = vmul.f32 %v986_v50, %v986_v50  ;;  %v859_v14 = vmul.f32 %v418_v19, %v418_v19 }
 0x19f   :  { %v1113_v4 = vadd.f32 %v1112_v18, %v1050_v27  ;;  %v987_v7 = vsub.f32 %v859_v14, %v923_v53 }
 0x1a1   :  { %v1051_v42 = vmul.f32 %v987_v7, %v987_v7 }
 0x1a3   :  { %v1114_v46 = vadd.f32 %v1113_v4, %v1051_v42 }
 0x1a5   :  { %1117 = vst [vmem:[%s1544_s2] sm:$0xff] %v1114_v46 }
 0x1a6   :  { %1122 = vsyncpa [#allocation3], 1 }
 0x1a7   :  { %1123 = vsyncpa [#allocation5], 1 }

</bundles_post_ra>
